<compile_context>
chip_gen: v6e
topology: v6e:2x2x1
jax: 0.10.0
libtpu: 0.0.40
codegen_flags: <defaults>
</compile_context>

<pallas_src>
import functools

import jax
import jax.numpy as jnp
from jax import lax
from jax.experimental import pallas as pl
from jax.experimental.pallas import tpu as pltpu


def _cdiv(a, b):
    return -(-a // b)


def _round_up(a, m):
    return _cdiv(a, m) * m


def _encoder_kernel(x_ref, w1_ref, b1_ref, w2_ref, b2_ref, wh_ref, bh_ref,
                    out_ref, *, latent_dim, discrete_dim):
    # x arrives as f32; cast to bf16 on the VPU (nearly free) for the MXU.
    x_bf = x_ref[...].astype(jnp.bfloat16)

    # Hidden stack: Linear -> tanh, Linear -> tanh (bf16 MXU, f32 accumulate).
    h = jnp.tanh(
        jnp.dot(x_bf, w1_ref[...], preferred_element_type=jnp.float32)
        + b1_ref[...])
    h = jnp.tanh(
        jnp.dot(h.astype(jnp.bfloat16), w2_ref[...],
                preferred_element_type=jnp.float32)
        + b2_ref[...])

    # Fused heads: one lane-dense slab z = [mu | sigma_pre | alpha_pre | 0-pad].
    z = (jnp.dot(h.astype(jnp.bfloat16), wh_ref[...],
                 preferred_element_type=jnp.float32)
         + bh_ref[...])

    col = lax.broadcasted_iota(jnp.int32, z.shape, 1)
    sig_mask = (col >= latent_dim) & (col < 2 * latent_dim)
    alp_mask = (col >= 2 * latent_dim) & (col < 2 * latent_dim + discrete_dim)

    # Masked softmax for the alpha head: mask to -inf BEFORE the exp so
    # non-alpha columns contribute exactly 0 (no inf intermediates, one fewer
    # full-slab select). Requires discrete_dim >= 1 (guarded in the wrapper).
    z_alpha = jnp.where(alp_mask, z, -jnp.inf)
    zmax = jnp.max(z_alpha, axis=-1, keepdims=True)
    e = jnp.exp(z_alpha - zmax)
    alpha = e / jnp.sum(e, axis=-1, keepdims=True)

    # softplus(x) = log(1 + exp(x)), computed stably as logaddexp(x, 0) (EUP).
    sp = jnp.logaddexp(z, 0.0)

    # mu columns come straight from z; sigma from sp; alpha from the softmax.
    out = jnp.where(alp_mask, alpha, jnp.where(sig_mask, sp, z))
    out_ref[...] = out.astype(out_ref.dtype)


def prepare_encoder_params(params, *, latent_dim, discrete_dim):
    """One-time parameter prep (hoisted out of the per-forward path).

    Concatenates the three head weights into a single lane-dense (hidden, 128)
    slab and pre-casts weights to bf16 / biases to f32.
    """
    assert discrete_dim >= 1, "softmax head requires discrete_dim >= 1"
    w1, b1, w2, b2, w11, b11, w12, b12, w13, b13 = params
    in_dim, hidden_dim = w1.shape
    head_w = 2 * latent_dim + discrete_dim
    head_pad = max(128, _round_up(head_w, 128))

    wh = jnp.pad(jnp.concatenate([w11, w12, w13], axis=1),
                 ((0, 0), (0, head_pad - head_w)))
    bh = jnp.pad(jnp.concatenate([b11, b12, b13], axis=1),
                 ((0, 0), (0, head_pad - head_w)))

    return {
        "w1": w1.astype(jnp.bfloat16), "b1": b1.astype(jnp.float32),
        "w2": w2.astype(jnp.bfloat16), "b2": b2.astype(jnp.float32),
        "wh": wh.astype(jnp.bfloat16), "bh": bh.astype(jnp.float32),
        "in_dim": in_dim, "hidden_dim": hidden_dim, "head_pad": head_pad,
        "latent_dim": latent_dim, "discrete_dim": discrete_dim,
    }


def fc_encoder_forward(x, prepped, *, tile_b_max=2048, out_dtype=jnp.float32):
    """x: any shape whose trailing elements flatten to in_dim (flat=True path)."""
    in_dim = prepped["in_dim"]
    hidden_dim = prepped["hidden_dim"]
    head_pad = prepped["head_pad"]
    latent_dim = prepped["latent_dim"]
    discrete_dim = prepped["discrete_dim"]

    # Concat of a single tensor is identity; flat=True -> view(-1, in_dim).
    # Kept in f32: the bf16 cast happens inside the kernel (saves an HBM pass).
    x2d = x.reshape(-1, in_dim).astype(jnp.float32)
    B = x2d.shape[0]

    # Batch tiling: even grid length (>= 2) so v7x's two TensorCores balance;
    # tile rows are a multiple of 8 (sublane) and capped at tile_b_max.
    b8 = _round_up(B, 8)
    ntiles = 2 * _cdiv(b8, 2 * tile_b_max)
    tile_b = _round_up(_cdiv(b8, ntiles), 8)
    b_padded = ntiles * tile_b
    if b_padded != B:
        x2d = jnp.pad(x2d, ((0, b_padded - B), (0, 0)))

    kernel = functools.partial(_encoder_kernel, latent_dim=latent_dim,
                               discrete_dim=discrete_dim)

    w1, b1 = prepped["w1"], prepped["b1"]
    w2, b2 = prepped["w2"], prepped["b2"]
    wh, bh = prepped["wh"], prepped["bh"]

    flops = 2 * b_padded * (in_dim * hidden_dim + hidden_dim * hidden_dim
                            + hidden_dim * head_pad)
    # tanh x2 per row over hidden, softplus (exp+log) + softmax exp over the slab.
    transcendentals = b_padded * (2 * hidden_dim + 3 * head_pad)
    bytes_accessed = (b_padded * in_dim * 4
                      + (w1.size + w2.size + wh.size) * 2
                      + (b1.size + b2.size + bh.size) * 4
                      + b_padded * head_pad * jnp.dtype(out_dtype).itemsize)

    def resident(arr):
        # Same block index for every grid step -> weight stays VMEM-resident.
        return pl.BlockSpec(arr.shape, lambda i: (0, 0))

    out = pl.pallas_call(
        kernel,
        out_shape=jax.ShapeDtypeStruct((b_padded, head_pad), out_dtype),
        grid=(ntiles,),
        in_specs=[
            pl.BlockSpec((tile_b, in_dim), lambda i: (i, 0)),
            resident(w1), resident(b1),
            resident(w2), resident(b2),
            resident(wh), resident(bh),
        ],
        out_specs=pl.BlockSpec((tile_b, head_pad), lambda i: (i, 0)),
        compiler_params=pltpu.CompilerParams(
            dimension_semantics=("parallel",)),
        cost_estimate=pl.CostEstimate(
            flops=flops, transcendentals=transcendentals,
            bytes_accessed=bytes_accessed),
    )(x2d, w1, b1, w2, b2, wh, bh)

    mu = out[:B, :latent_dim].astype(jnp.float32)
    sigma = out[:B, latent_dim:2 * latent_dim].astype(jnp.float32)
    alpha = out[:B, 2 * latent_dim:2 * latent_dim + discrete_dim].astype(jnp.float32)
    return mu, sigma, alpha


def init_params(key, in_dim, hidden_dim, latent_dim, discrete_dim):
    """Deterministic synthetic parameters. Weights stored (in, out) == torch W.T."""
    ks = jax.random.split(key, 10)

    def lin(kw, kb, fan_in, fan_out):
        # torch.nn.Linear default init: U(-1/sqrt(fan_in), 1/sqrt(fan_in))
        bound = 1.0 / jnp.sqrt(fan_in)
        w = jax.random.uniform(kw, (fan_in, fan_out), jnp.float32, -bound, bound)
        b = jax.random.uniform(kb, (1, fan_out), jnp.float32, -bound, bound)
        return w, b

    w1, b1 = lin(ks[0], ks[1], in_dim, hidden_dim)
    w2, b2 = lin(ks[2], ks[3], hidden_dim, hidden_dim)
    w11, b11 = lin(ks[4], ks[5], hidden_dim, latent_dim)
    w12, b12 = lin(ks[6], ks[7], hidden_dim, latent_dim)
    w13, b13 = lin(ks[8], ks[9], hidden_dim, discrete_dim)
    return (w1, b1, w2, b2, w11, b11, w12, b12, w13, b13)


def reference_forward(x, params):
    """Pure-JAX reference mirroring the kernel's bf16-input / f32-accum numerics."""
    w1, b1, w2, b2, w11, b11, w12, b12, w13, b13 = params
    in_dim = w1.shape[0]
    bf = jnp.bfloat16
    h = x.reshape(-1, in_dim).astype(bf)
    h = jnp.tanh(jnp.dot(h, w1.astype(bf), preferred_element_type=jnp.float32) + b1)
    h = jnp.tanh(jnp.dot(h.astype(bf), w2.astype(bf),
                         preferred_element_type=jnp.float32) + b2)
    hb = h.astype(bf)
    mu = jnp.dot(hb, w11.astype(bf), preferred_element_type=jnp.float32) + b11
    sigma = jax.nn.softplus(
        jnp.dot(hb, w12.astype(bf), preferred_element_type=jnp.float32) + b12)
    alpha = jax.nn.softmax(
        jnp.dot(hb, w13.astype(bf), preferred_element_type=jnp.float32) + b13,
        axis=-1)
    return mu, sigma, alpha


if __name__ == "__main__":
    # Module config: in_dim=(16, 16) -> 256, latent_dim=2, discrete_dim=3,
    # hidden_dim=32, num_layers=2, activation='tanh', softplus_out=True, flat=True
    H, W = 16, 16
    in_dim = H * W
    hidden_dim = 32
    latent_dim = 2
    discrete_dim = 3
    batch = 2

    key = jax.random.PRNGKey(0)
    kx, kp, kx2 = jax.random.split(key, 3)
    x = jax.random.normal(kx, (batch, H, W), dtype=jnp.float32)
    params = init_params(kp, in_dim, hidden_dim, latent_dim, discrete_dim)

    # One-time parameter prep (hoisted out of the forward path).
    prepped = prepare_encoder_params(params, latent_dim=latent_dim,
                                     discrete_dim=discrete_dim)
    prepped = jax.tree_util.tree_map(
        lambda v: jax.block_until_ready(v) if isinstance(v, jax.Array) else v,
        prepped)

    # --- small batch, f32 output (default precision) ---
    mu, sigma, alpha = fc_encoder_forward(x, prepped)
    jax.block_until_ready((mu, sigma, alpha))

    mu_r, sigma_r, alpha_r = reference_forward(x, params)
    assert mu.shape == (batch, latent_dim)
    assert sigma.shape == (batch, latent_dim)
    assert alpha.shape == (batch, discrete_dim)
    assert jnp.allclose(mu, mu_r, atol=1e-3, rtol=1e-3)
    assert jnp.allclose(sigma, sigma_r, atol=1e-3, rtol=1e-3)
    assert jnp.allclose(alpha, alpha_r, atol=1e-3, rtol=1e-3)
    assert jnp.allclose(jnp.sum(alpha, axis=-1), 1.0, atol=1e-5)

    # --- larger, non-tile-aligned batch exercises the even-grid path ---
    x_big = jax.random.normal(kx2, (1200, H, W), dtype=jnp.float32)
    mu_b, sigma_b, alpha_b = fc_encoder_forward(x_big, prepped)
    jax.block_until_ready((mu_b, sigma_b, alpha_b))
    mu_rb, sigma_rb, alpha_rb = reference_forward(x_big, params)
    assert mu_b.shape == (1200, latent_dim)
    assert sigma_b.shape == (1200, latent_dim)
    assert alpha_b.shape == (1200, discrete_dim)
    assert jnp.allclose(mu_b, mu_rb, atol=1e-3, rtol=1e-3)
    assert jnp.allclose(sigma_b, sigma_rb, atol=1e-3, rtol=1e-3)
    assert jnp.allclose(alpha_b, alpha_rb, atol=1e-3, rtol=1e-3)

    # --- optional bf16 output slab (halves writeback HBM traffic); looser tol ---
    mu_h, sigma_h, alpha_h = fc_encoder_forward(x, prepped,
                                                out_dtype=jnp.bfloat16)
    jax.block_until_ready((mu_h, sigma_h, alpha_h))
    assert jnp.allclose(mu_h, mu_r, atol=2e-2, rtol=2e-2)
    assert jnp.allclose(sigma_h, sigma_r, atol=2e-2, rtol=2e-2)
    assert jnp.allclose(alpha_h, alpha_r, atol=2e-2, rtol=2e-2)

    print("KERNEL_OK")
</pallas_src>

<mosaic_0001>
module attributes {stable_mosaic.version = 11 : i64} {
  func.func @_encoder_kernel(%arg0: i32, %arg1: memref<8x256xf32, #tpu.memory_space<vmem>>, %arg2: memref<256x32xbf16, #tpu.memory_space<vmem>>, %arg3: memref<1x32xf32, #tpu.memory_space<vmem>>, %arg4: memref<32x32xbf16, #tpu.memory_space<vmem>>, %arg5: memref<1x32xf32, #tpu.memory_space<vmem>>, %arg6: memref<32x128xbf16, #tpu.memory_space<vmem>>, %arg7: memref<1x128xf32, #tpu.memory_space<vmem>>, %arg8: memref<8x128xf32, #tpu.memory_space<vmem>>) attributes {dimension_semantics = [#tpu.dimension_semantics<parallel>], iteration_bounds = array<i64: 2>, scalar_prefetch = 0 : i64, scratch_operands = 0 : i64, tpu.core_type = #tpu.core_type<tc>, window_params = [{transform_indices = @transform_0, window_bounds = array<i64: 8, 256>}, {pipeline_mode = #tpu.pipeline_mode<synchronous>, transform_indices = @transform_1, window_bounds = array<i64: 256, 32>}, {pipeline_mode = #tpu.pipeline_mode<synchronous>, transform_indices = @transform_2, window_bounds = array<i64: 1, 32>}, {pipeline_mode = #tpu.pipeline_mode<synchronous>, transform_indices = @transform_3, window_bounds = array<i64: 32, 32>}, {pipeline_mode = #tpu.pipeline_mode<synchronous>, transform_indices = @transform_4, window_bounds = array<i64: 1, 32>}, {pipeline_mode = #tpu.pipeline_mode<synchronous>, transform_indices = @transform_5, window_bounds = array<i64: 32, 128>}, {pipeline_mode = #tpu.pipeline_mode<synchronous>, transform_indices = @transform_6, window_bounds = array<i64: 1, 128>}, {transform_indices = @transform_7, window_bounds = array<i64: 8, 128>}]} {
    %c0 = arith.constant 0 : index
    %c0_0 = arith.constant 0 : index
    %0 = vector.load %arg1[%c0, %c0_0] : memref<8x256xf32, #tpu.memory_space<vmem>>, vector<8x256xf32>
    %1 = arith.truncf %0 : vector<8x256xf32> to vector<8x256xbf16>
    %c0_1 = arith.constant 0 : index
    %c0_2 = arith.constant 0 : index
    %2 = vector.load %arg2[%c0_1, %c0_2] : memref<256x32xbf16, #tpu.memory_space<vmem>>, vector<256x32xbf16>
    %cst = arith.constant dense<0.000000e+00> : vector<8x32xf32>
    %3 = tpu.matmul %1, %2, %cst {dimension_numbers = #tpu.dot_dimension_numbers<[1], [0], [0], [1], [0, 0, 1, 1], [], []>} : vector<8x256xbf16>, vector<256x32xbf16>, vector<8x32xf32> -> vector<8x32xf32>
    %c0_3 = arith.constant 0 : index
    %c0_4 = arith.constant 0 : index
    %4 = vector.load %arg3[%c0_3, %c0_4] : memref<1x32xf32, #tpu.memory_space<vmem>>, vector<1x32xf32>
    %5 = vector.broadcast %4 : vector<1x32xf32> to vector<8x32xf32>
    %6 = arith.addf %3, %5 : vector<8x32xf32>
    %7 = math.tanh %6 : vector<8x32xf32>
    %8 = arith.truncf %7 : vector<8x32xf32> to vector<8x32xbf16>
    %c0_5 = arith.constant 0 : index
    %c0_6 = arith.constant 0 : index
    %9 = vector.load %arg4[%c0_5, %c0_6] : memref<32x32xbf16, #tpu.memory_space<vmem>>, vector<32x32xbf16>
    %cst_7 = arith.constant dense<0.000000e+00> : vector<8x32xf32>
    %10 = tpu.matmul %8, %9, %cst_7 {dimension_numbers = #tpu.dot_dimension_numbers<[1], [0], [0], [1], [0, 0, 1, 1], [], []>} : vector<8x32xbf16>, vector<32x32xbf16>, vector<8x32xf32> -> vector<8x32xf32>
    %c0_8 = arith.constant 0 : index
    %c0_9 = arith.constant 0 : index
    %11 = vector.load %arg5[%c0_8, %c0_9] : memref<1x32xf32, #tpu.memory_space<vmem>>, vector<1x32xf32>
    %12 = vector.broadcast %11 : vector<1x32xf32> to vector<8x32xf32>
    %13 = arith.addf %10, %12 : vector<8x32xf32>
    %14 = math.tanh %13 : vector<8x32xf32>
    %15 = arith.truncf %14 : vector<8x32xf32> to vector<8x32xbf16>
    %c0_10 = arith.constant 0 : index
    %c0_11 = arith.constant 0 : index
    %16 = vector.load %arg6[%c0_10, %c0_11] : memref<32x128xbf16, #tpu.memory_space<vmem>>, vector<32x128xbf16>
    %cst_12 = arith.constant dense<0.000000e+00> : vector<8x128xf32>
    %17 = tpu.matmul %15, %16, %cst_12 {dimension_numbers = #tpu.dot_dimension_numbers<[1], [0], [0], [1], [0, 0, 1, 1], [], []>} : vector<8x32xbf16>, vector<32x128xbf16>, vector<8x128xf32> -> vector<8x128xf32>
    %c0_13 = arith.constant 0 : index
    %c0_14 = arith.constant 0 : index
    %18 = vector.load %arg7[%c0_13, %c0_14] : memref<1x128xf32, #tpu.memory_space<vmem>>, vector<1x128xf32>
    %19 = vector.broadcast %18 : vector<1x128xf32> to vector<8x128xf32>
    %20 = arith.addf %17, %19 : vector<8x128xf32>
    %21 = tpu.iota {dimensions = array<i32: 1>} : vector<8x128xi32>
    %c2_i32 = arith.constant 2 : i32
    %22 = vector.broadcast %c2_i32 : i32 to vector<8x128xi32>
    %23 = arith.cmpi sge, %21, %22 : vector<8x128xi32>
    %c4_i32 = arith.constant 4 : i32
    %24 = vector.broadcast %c4_i32 : i32 to vector<8x128xi32>
    %25 = arith.cmpi slt, %21, %24 : vector<8x128xi32>
    %26 = arith.andi %23, %25 : vector<8x128xi1>
    %c4_i32_15 = arith.constant 4 : i32
    %27 = vector.broadcast %c4_i32_15 : i32 to vector<8x128xi32>
    %28 = arith.cmpi sge, %21, %27 : vector<8x128xi32>
    %c7_i32 = arith.constant 7 : i32
    %29 = vector.broadcast %c7_i32 : i32 to vector<8x128xi32>
    %30 = arith.cmpi slt, %21, %29 : vector<8x128xi32>
    %31 = arith.andi %28, %30 : vector<8x128xi1>
    %cst_16 = arith.constant 0xFF800000 : f32
    %32 = vector.broadcast %cst_16 : f32 to vector<8x128xf32>
    %33 = arith.select %31, %20, %32 : vector<8x128xi1>, vector<8x128xf32>
    %cst_17 = arith.constant dense<0xFF800000> : vector<8xf32>
    %34 = vector.multi_reduction <maximumf>, %33, %cst_17 [1] : vector<8x128xf32> to vector<8xf32>
    %35 = vector.shape_cast %34 : vector<8xf32> to vector<8x1xf32>
    %36 = vector.broadcast %35 : vector<8x1xf32> to vector<8x128xf32>
    %37 = arith.subf %33, %36 : vector<8x128xf32>
    %38 = math.exp %37 : vector<8x128xf32>
    %cst_18 = arith.constant dense<0.000000e+00> : vector<8xf32>
    %39 = vector.multi_reduction <add>, %38, %cst_18 [1] : vector<8x128xf32> to vector<8xf32>
    %40 = vector.shape_cast %39 : vector<8xf32> to vector<8x1xf32>
    %41 = vector.broadcast %40 : vector<8x1xf32> to vector<8x128xf32>
    %42 = arith.divf %38, %41 : vector<8x128xf32>
    %cst_19 = arith.constant 0.000000e+00 : f32
    %43 = vector.broadcast %cst_19 : f32 to vector<8x128xf32>
    %44 = arith.maximumf %20, %43 : vector<8x128xf32>
    %45 = vector.broadcast %cst_19 : f32 to vector<8x128xf32>
    %46 = arith.subf %20, %45 : vector<8x128xf32>
    %47 = arith.cmpf one, %46, %46 : vector<8x128xf32>
    %48 = vector.broadcast %cst_19 : f32 to vector<8x128xf32>
    %49 = arith.addf %20, %48 : vector<8x128xf32>
    %50 = math.absf %46 : vector<8x128xf32>
    %cst_20 = arith.constant 0.000000e+00 : f32
    %51 = vector.broadcast %cst_20 : f32 to vector<8x128xf32>
    %52 = arith.subf %51, %50 : vector<8x128xf32>
    %53 = math.exp %52 : vector<8x128xf32>
    %54 = math.log1p %53 : vector<8x128xf32>
    %55 = arith.addf %44, %54 : vector<8x128xf32>
    %56 = arith.select %47, %49, %55 : vector<8x128xi1>, vector<8x128xf32>
    %57 = arith.select %26, %56, %20 : vector<8x128xi1>, vector<8x128xf32>
    %58 = arith.select %31, %42, %57 : vector<8x128xi1>, vector<8x128xf32>
    %c0_21 = arith.constant 0 : index
    %c0_22 = arith.constant 0 : index
    %59 = vector.load %arg8[%c0_21, %c0_22] : memref<8x128xf32, #tpu.memory_space<vmem>>, vector<8x128xf32>
    tpu.vector_store %arg8[%c0_21, %c0_22], %58 {strides = array<i32>} : memref<8x128xf32, #tpu.memory_space<vmem>>, vector<8x128xf32>,
    return
  }
  func.func @transform_0(%arg0: i32) -> (i32, i32) {
    %c0_i32 = arith.constant 0 : i32
    %c0_i32_0 = arith.constant 0 : i32
    return %arg0, %c0_i32 : i32, i32
  }
  func.func @transform_1(%arg0: i32) -> (i32, i32) {
    %c0_i32 = arith.constant 0 : i32
    %c0_i32_0 = arith.constant 0 : i32
    %c0_i32_1 = arith.constant 0 : i32
    return %c0_i32, %c0_i32_0 : i32, i32
  }
  func.func @transform_2(%arg0: i32) -> (i32, i32) {
    %c0_i32 = arith.constant 0 : i32
    %c0_i32_0 = arith.constant 0 : i32
    %c0_i32_1 = arith.constant 0 : i32
    return %c0_i32, %c0_i32_0 : i32, i32
  }
  func.func @transform_3(%arg0: i32) -> (i32, i32) {
    %c0_i32 = arith.constant 0 : i32
    %c0_i32_0 = arith.constant 0 : i32
    %c0_i32_1 = arith.constant 0 : i32
    return %c0_i32, %c0_i32_0 : i32, i32
  }
  func.func @transform_4(%arg0: i32) -> (i32, i32) {
    %c0_i32 = arith.constant 0 : i32
    %c0_i32_0 = arith.constant 0 : i32
    %c0_i32_1 = arith.constant 0 : i32
    return %c0_i32, %c0_i32_0 : i32, i32
  }
  func.func @transform_5(%arg0: i32) -> (i32, i32) {
    %c0_i32 = arith.constant 0 : i32
    %c0_i32_0 = arith.constant 0 : i32
    %c0_i32_1 = arith.constant 0 : i32
    return %c0_i32, %c0_i32_0 : i32, i32
  }
  func.func @transform_6(%arg0: i32) -> (i32, i32) {
    %c0_i32 = arith.constant 0 : i32
    %c0_i32_0 = arith.constant 0 : i32
    %c0_i32_1 = arith.constant 0 : i32
    return %c0_i32, %c0_i32_0 : i32, i32
  }
  func.func @transform_7(%arg0: i32) -> (i32, i32) {
    %c0_i32 = arith.constant 0 : i32
    %c0_i32_0 = arith.constant 0 : i32
    return %arg0, %c0_i32 : i32, i32
  }
}

</mosaic_0001>

<bundles_post_ra>
// kernel: tpu_custom_call.1
= control target key start
LH: loop header
LB: loop body
LE: loop exit
PB: predicated region body
PF: predicated region fallthrough
CT: control target
= control target key end

     0   :  { %12 = vsyncpa [#allocation3], 0  ;;  %s1143_s0 = inlined_call_operand.vmem [shape: f32[16,256], index: 0, kind: input, shape index: {}]   ;;  %s1144_s1 = inlined_call_operand.vmem [shape: bf16[256,32], index: 1, kind: input, shape index: {}]   ;;  %s1145_s2 = inlined_call_operand.vmem [shape: f32[1,32], index: 2, kind: input, shape index: {}]   ;;  %s1146_s3 = inlined_call_operand.vmem [shape: bf16[32,32], index: 3, kind: input, shape index: {}]   ;;  %s1147_s4 = inlined_call_operand.vmem [shape: f32[1,32], index: 4, kind: input, shape index: {}]   ;;  %s1148_s5 = inlined_call_operand.vmem [shape: bf16[32,128], index: 5, kind: input, shape index: {}]   ;;  %s1149_s6 = inlined_call_operand.vmem [shape: f32[1,128], index: 6, kind: input, shape index: {}]   ;;  %s1150_s7 = inlined_call_operand.hbm [shape: f32[16,128], index: 7, kind: output, shape index: {}]  }
   0x1   :  { %14 = vsyncpa [#allocation3 + $0x1], 0  ;;  %s965_s24 = smov 0   ;;  %s967_s25 = smov 0  }
   0x2   :  { %s969_s26 = smov 0   ;;  %s971_s27 = smov 0  }
   0x3 LB: > { %s986_s28 = sadd.s32 4294967295, %s920_s27   ;;  %s706_s29 = sadd.s32 4294967294, %s920_s27   ;;  %s920_s27 = sphi %s971_s27, %s1160_s27   ;;  %s916_s26 = sphi %s969_s26, %s1159_s26   ;;  %s912_s25 = sphi %s967_s25, %s1158_s25   ;;  %s908_s24 = sphi %s965_s24, %s1157_s24  }
   0x4   : > { %s990_s30 = sadd.s32 1, %s920_s27   ;;  %s179_s8 = sadd.s32 1, %s916_s26 }
   0x5   : > { %s176_s9 = ssub.s32 %s920_s27, %s990_s30  ;;  %p189_p0 = scmp.ne.s32.totalorder %s916_s26, %s912_s25 }
   0x6   : > { %p177_p1 = scmp.eq.s32.totalorder %s176_s9, 0  ;;  %p190_p2 = scmp.eq.s32.totalorder %s986_s28, 1 }
   0x7   : > { %p195_p3 = scmp.ne.s32.totalorder %s912_s25, %s908_s24  ;;  %p196_p4 = scmp.eq.s32.totalorder %s706_s29, 1 }
   0x8   : > { %s1001_s10 = scalar_select %p177_p1, %s916_s26, %s179_s8  }
   0x9   : > { %p1003_p5 = por %p190_p2, %p189_p0  ;;  %p1007_p6 = por %p196_p4, %p195_p3 }
   0xa   : > { %p709_p7 = scmp.ge.s32.totalorder %s920_s27, 1  ;;  %p240_p8 = scmp.lt.s32.totalorder %s920_s27, 3 }
   0xc   : > { %p241_p9 = pnand %p709_p7, %p240_p8 }
   0xd   : > { %p272_p10 = scmp.lt.s32.totalorder (!%p241_p9), %s986_s28, 1  ;;  %s269_s29 = sand.u32 (!%p241_p9), 1, %s912_s25  }
   0xe   : > { %244 = sbr.rel (%p241_p9) target bundleno = 998 (0x3e6), region = 48  ;;  %s739_s8 = sshll.u32 (!%p241_p9), %s986_s28, 7 }
   0xf   : > { %s1106_s15 = scalar_lea.hbm (!%p241_p9), %s1150_s7, %s739_s8  ;;  %s634_s16 = scalar_lea.sflag (!%p241_p9), [#allocation3], %s269_s29 }
  0x13   : > { %v828_v0 = vld [vmem:[%s1144_s1 + $0x78] sm:$0xff]   ;;  %v830_v2 = vld [vmem:[%s1144_s1 + $0x70] sm:$0xff]   ;;  %v832_v4 = vld [vmem:[%s1144_s1 + $0x68] sm:$0xff]   ;;  %s273_s23 = scalar_select %p272_p10, %s986_s28, 1  ;;  %v922_v21 = vmov 0.0   ;;  %vm923_vm0 = vmmov 0   ;;  %v594_v42 = vlaneseq }
  0x14   : > { %v829_v1 = vld [vmem:[%s1144_s1 + $0x38] sm:$0xff]   ;;  %743 = vmatprep.subr.bf16.mxu0 %v828_v0  ;;  %v831_v3 = vld [vmem:[%s1144_s1 + $0x30] sm:$0xff]   ;;  %v833_v5 = vld [vmem:[%s1144_s1 + $0x28] sm:$0xff]   ;;  %771 = vmatprep.subr.bf16.mxu1 %v922_v21  ;;  %vm482_vm1 = vcmask 261120   ;;  %s924_s28 = smov [#allocation2]  }
  0x15   : > { %744 = vmatpush3.bf16.msra.mxu0 %v829_v1  ;;  %v834_v6 = vld [vmem:[%s1144_s1 + $0x60] sm:$0xff]   ;;  %s742_s14 = sshll.u32 %s273_s23, 4  ;;  %v836_v8 = vld [vmem:[%s1144_s1 + $0x58] sm:$0xff]   ;;  %v838_v10 = vld [vmem:[%s1144_s1 + $0x50] sm:$0xff]   ;;  %775 = vmatprep.mubr.msk.bf16.mxu1 %vm923_vm0, %v922_v21  ;;  %v595_v43 = vand.u32 127, %v594_v42  ;;  %s710_s23 = sshll.u32 %s269_s29, 3 }
  0x16   : > { %745 = vmatprep.subr.bf16.mxu0 %v830_v2  ;;  %v835_v7 = vld [vmem:[%s1144_s1 + $0x20] sm:$0xff]   ;;  %s276_s21 = scalar_lea.vmem %s1143_s0, %s742_s14  ;;  %v837_v9 = vld [vmem:[%s1144_s1 + $0x18] sm:$0xff]   ;;  %v839_v13 = vld [vmem:[%s1144_s1 + $0x10] sm:$0xff]   ;;  %s271_s9 = scalar_lea.vmem [#allocation2], %s710_s23 }
  0x17   : > { %v279_v11 = vld [vmem:[%s276_s21 + $0x8] sm:$0xff]  ;;  %v842_v16 = vld [vmem:[%s1144_s1 + $0x40] sm:$0xff]   ;;  %vm599_vm2 = vcmp.ge.s32.totalorder %v595_v43, 4  ;;  %vm600_vm3 = vcmp.lt.s32.totalorder %v595_v43, 7  ;;  %vm596_vm5 = vcmp.ge.s32.totalorder %v595_v43, 2  ;;  %vm597_vm6 = vcmp.lt.s32.totalorder %v595_v43, 4 }
  0x18   : > { %v281_v12 = vpack.c.bf16 %v279_v11, %v279_v11  ;;  %v840_v14 = vld [vmem:[%s1144_s1 + $0x48] sm:$0xff]   ;;  %v843_v17 = vld [vmem:[%s1144_s1] sm:$0xff]   ;;  %vm1089_vm4 = vmand %vm599_vm2, %vm600_vm3  ;;  %s864_s18 = sshll.u32 %s924_s28, 4  ;;  %s865_s18 = int_to_ptr.vmem [resolvable:$false] %s864_s18 }
  0x19   : > { %746 = vmatpush3.bf16.msra.mxu0 %v831_v3  ;;  %v841_v15 = vld [vmem:[%s1144_s1 + $0x8] sm:$0xff]   ;;  %v278_v18 = vld [vmem:[%s276_s21] sm:$0xff]  ;;  %vm1095_vm8 = vmand %vm596_vm5, %vm597_vm6  ;;  %s647_s21 = sshll.u32 %s271_s9, 4  ;;  %s866_s19 = scalar_lea.vmem %s865_s18, 256  ;;  %s648_s21 = int_to_ptr.vmem [resolvable:$true] %s647_s21 }
  0x1a   : > { %747 = vmatprep.subr.bf16.mxu0 %v832_v4  ;;  %449 = vmatprep.mubr.bf16.mxu0 %v281_v12  ;;  %v280_v19 = vpack.c.bf16 %v278_v18, %v278_v18  ;;  %v844_v20 = vld [vmem:[%s1146_s3 + $0x8] sm:$0xff]   ;;  %v845_v22 = vld [vmem:[%s1146_s3] sm:$0xff]   ;;  %s860_s17 = scalar_lea.vmem %s648_s21, 128  ;;  %p867_p0 = scmp.lt.s32.totalorder %s648_s21, %s865_s18 }
  0x1b   : > { %772 = vmatpush3.bf16.msra.mxu1 %v844_v20  ;;  %v713_v24 = vld [vmem:[%s1145_s2] ss:$0 sm:$0xff]  ;;  %v846_v32 = vld [vmem:[%s1148_s5 + $0x8] sm:$0xff]   ;;  %p861_p11 = scmp.ne.s32.totalorder %s648_s21, %s860_s17  ;;  %p868_p1 = scmp.lt.s32.totalorder %s866_s19, %s860_s17 }
  0x1c   : > { %773 = vmatprep.subr.bf16.mxu1 %v922_v21  ;;  %v847_v33 = vld [vmem:[%s1148_s5] sm:$0xff]  }
  0x1d   : > { %748 = vmatpush3.bf16.msra.mxu0 %v833_v5  ;;  %v730_v34 = vld [vmem:[%s1147_s4] ss:$0 sm:$0xff]  ;;  %p862_p12 = pnand %p861_p11, %p1003_p5  ;;  %p869_p2 = por %p868_p1, %p867_p0 }
  0x1e   : > { %749 = vmatprep.subr.bf16.mxu0 %v834_v6  ;;  %v734_v44 = vld [vmem:[%s1149_s6] ss:$0 sm:$0xff] }
  0x1f   : > { %774 = vmatpush3.bf16.msra.mxu1 %v845_v22  ;;  %p863_p13 = pneg %p862_p12 }
  0x20   : > { %779 = vmatprep.subr.bf16.mxu1 %v922_v21 }
  0x21   : > { %750 = vmatpush3.bf16.msra.mxu0 %v835_v7  ;;  %p870_p3 = pnand %p869_p2, %p863_p13 }
  0x22   : > { %751 = vmatprep.subr.bf16.mxu0 %v836_v8 }
  0x25   : > { %752 = vmatpush3.bf16.msra.mxu0 %v837_v9 }
  0x26   : > { %753 = vmatprep.subr.bf16.mxu0 %v838_v10 }
  0x29   : > { %754 = vmatpush3.bf16.msra.mxu0 %v839_v13 }
  0x2a   : > { %755 = vmatprep.subr.bf16.mxu0 %v840_v14 }
  0x2d   : > { %756 = vmatpush3.bf16.msra.mxu0 %v841_v15 }
  0x2e   : > { %757 = vmatprep.subr.bf16.mxu0 %v842_v16 }
  0x31   : > { %758 = vmatpush3.bf16.msra.mxu0 %v843_v17 }
  0x34   : > { %450 = vmatmul.mubr.bf16.vlgmr.msra.gmra.mxu0 %v280_v19 }
  0xf4   : > { %v759_v23 = vpop.f32.mrf.mxu0 }
  0xf6   : > { %v760_v25 = vpop.f32.mrf.mxu0 }
  0xf7   : > { %v761_v26 = vadd.f32 %v760_v25, %v759_v23 }
  0xf8   : > { %v762_v27 = vpop.f32.mrf.mxu0 }
  0xf9   : > { %v452_v28 = vadd.f32 %v761_v26, %v713_v24 }
  0xfa   : > { %v763_v29 = vpop.f32.mrf.mxu0 }
  0xfb   : > { %848 = vtanh.f32 %v452_v28 }
 0x108   : > { %v849_v30 = vpop.eup %848 }
 0x109   : > { %v458_v31 = vpack.c.bf16 %v849_v30, %v849_v30 }
 0x10b   : > { %776 = vmatmul.mubr.msk.bf16.vlgmr.msra.gmra.mxu1 %vm482_vm1, %v458_v31 }
 0x10c   : > { %783 = vmatprep.mubr.msk.bf16.mxu1 %vm923_vm0, %v922_v21  ;;  %780 = vmatpush3.bf16.msra.mxu1 %v846_v32 }
 0x10d   : > { %781 = vmatprep.subr.bf16.mxu1 %v922_v21 }
 0x110   : > { %782 = vmatpush3.bf16.msra.mxu1 %v847_v33 }
 0x1cb   : > { %v520_v35 = vpop.f32.mrf.mxu1 }
 0x1cc   : > { %v521_v36 = vadd.f32 %v730_v34, %v520_v35 }
 0x1cd   : > { %v777_v37 = vpop.f32.mrf.mxu1 }
 0x1ce   : > { %850 = vtanh.f32 %v521_v36 }
 0x1cf   : > { %v523_v38 = vpop.f32.mrf.mxu1 }
 0x1d1   : > { %v778_v39 = vpop.f32.mrf.mxu1 }
 0x1db   : > { %v851_v40 = vpop.eup %850 }
 0x1dc   : > { %v527_v41 = vpack.c.bf16 %v851_v40, %v851_v40 }
 0x1de   : > { %784 = vmatmul.mubr.msk.bf16.vlgmr.msra.gmra.mxu1 %vm482_vm1, %v527_v41 }
 0x29e   : > { %v588_v45 = vpop.f32.mrf.mxu1 }
 0x29f   : > { %v589_v47 = vadd.f32 %v734_v44, %v588_v45 }
 0x2a0   : > { %v785_v48 = vpop.f32.mrf.mxu1 }
 0x2a1   : > { %v615_v49 = vand.u32 2147483647, %v589_v47  ;;  %v602_v50 = vsel %vm1089_vm4, %v589_v47, -inf  ;;  %v612_v63 = vmax.f32 %v589_v47, 0.0  ;;  %vm613_vm9 = vcmp.ne.f32.partialorder %v589_v47, %v589_v47 }
 0x2a2   : > { %603 = vmax.xlane.f32.xlu0 %v602_v50  ;;  %v591_v51 = vpop.f32.mrf.mxu1 }
 0x2a3   : > { %v616_v52 = vsub.f32 0.0, %v615_v49 }
 0x2a4   : > { %v786_v53 = vpop.f32.mrf.mxu1 }
 0x2a5   : > { %v617_v54 = vmul.f32 1.442695, %v616_v52 }
 0x2a7   : > { %852 = vpow2.f32 %v617_v54 }
 0x2b4   : > { %v853_v55 = vpop.eup %852 }
 0x2b5   : > { %v619_v56 = vadd.f32 1.0, %v853_v55  ;;  %v622_v57 = vmul.f32 -0.5, %v853_v55  ;;  %v625_v59 = vand.u32 2147483647, %v853_v55 }
 0x2b7   : > { %854 = vlog2.f32 %v619_v56  ;;  %v623_v58 = vadd.f32 1.0, %v622_v57  ;;  %vm626_vm7 = vcmp.lt.f32.partialorder %v625_v59, 0.0004427343 }
 0x2b9   : > { %v624_v62 = vmul.f32 %v853_v55, %v623_v58 }
 0x2c4   : > { %v855_v60 = vpop.eup %854 }
 0x2c5   : > { %v621_v61 = vmul.f32 0.6931472, %v855_v60 }
 0x2c7   : > { %v627_v0 = vsel %vm626_vm7, %v624_v62, %v621_v61 }
 0x2c8   : > { %v628_v2 = vadd.f32 %v627_v0, %v612_v63 }
 0x2ca   : > { %v629_v3 = vsel %vm613_vm9, %v589_v47, %v628_v2 }
 0x2cb   : > { %v630_v4 = vsel %vm1095_vm8, %v629_v3, %v589_v47 }
 0x32b   : > { %v604_v5 = vpop.xlane.xlu0 %603 }
 0x32c   : > { %v605_v6 = vsub.f32 %v602_v50, %v604_v5 }
 0x32e   : > { %v606_v7 = vmul.f32 1.442695, %v605_v6 }
 0x330   : > { %856 = vpow2.f32 %v606_v7 }
 0x33d   : > { %v857_v8 = vpop.eup %856 }
 0x33e   : > { %608 = vadd.xlane.f32.xlu0 %v857_v8 }
 0x3c7   : > { %v609_v9 = vpop.xlane.xlu0 %608 }
 0x3c8   : > { %858 = vrcp.f32 %v609_v9 }
 0x3d5   : > { %v859_v10 = vpop.eup %858 }
 0x3d6   : > { %v611_v11 = vmul.f32 %v859_v10, %v857_v8 }
 0x3d8   : > { %v631_v12 = vsel %vm1089_vm4, %v611_v11, %v630_v4 }
 0x3d9   : > { %632 = vst [vmem:[%s271_s9] sm:$0xff] %v631_v12 }
 0x3da   : > { %873 = shalt.err (!%p870_p3)
}
 0x3db   : > { %s874_s20 = scalar_lea.hbm %s1106_s15, 128  ;;  %s878_s23 = scalar_lea.hbm %s1150_s7, 256 }
 0x3dc   : > { %p875_p4 = scmp.ne.s32.totalorder %s1106_s15, %s874_s20  ;;  %p879_p9 = scmp.lt.s32.totalorder %s1106_s15, %s1150_s7 }
 0x3dd   : > { %p880_p10 = scmp.lt.s32.totalorder %s878_s23, %s874_s20 }
 0x3de   : > { %p876_p7 = pnand %p875_p4, %p1003_p5 }
 0x3df   : > { %p881_p11 = por %p880_p10, %p879_p9 }
 0x3e0   : > { %p877_p8 = pneg %p876_p7 }
 0x3e2   : > { %p882_p12 = pnand %p881_p11, %p877_p8 }
 0x3e4   : > { %885 = shalt.err (!%p882_p12)
}
 0x3e5   : > { %787 = dma.vmem_to_hbm [thread:$0]  (%p1003_p5), %s648_s21, 128, %s1106_s15, %s634_s16  }
 0x3e6 PF: > { %p793_p13 = scmp.ge.s32.totalorder %s920_s27, 2  ;;  %s659_s13 = sand.u32 1, %s908_s24  }
 0x3e7   : > { %s660_s14 = scalar_lea.sflag [#allocation3], %s659_s13 }
 0x3e8   : > { %p790_p0 = pnand %p793_p13, %p1007_p6 }
 0x3ea   : > { %p791_p1 = pneg %p790_p0 }
 0x3ec   : > { %903 = dma.done.wait (%p791_p1), %s660_s14, 128  }
 0x3ed   : > { %905 = vsyncadd (%p791_p1), %s660_s14, 4294967168  ;;  %p17_p2 = scmp.ge.s32.totalorder %s990_s30, 4   ;;  %s1157_s24 = smov %s912_s25 }
 0x3ee   : > { %s1158_s25 = smov %s916_s26  ;;  %s1159_s26 = smov %s1001_s10 }
 0x3ef   : > { %s1160_s27 = smov %s990_s30  ;;  %19 = sbr.rel (!%p17_p2) target bundleno = 3 (0x3), region = 83 }
 0x3f4   :  { %665 = vsyncpa [#allocation3], 1 }
 0x3f5   :  { %667 = vsyncpa [#allocation3 + $0x1], 1 }

</bundles_post_ra>
